<compile_context>
chip_gen: v5e
topology: v5e:2x2
jax: 0.10.0
libtpu: 0.0.40
codegen_flags: <defaults>
</compile_context>

<pallas_src>
import functools

import jax
import jax.numpy as jnp
from jax.experimental import pallas as pl
from jax.experimental.pallas import tpu as pltpu

_H1, _H2 = 128, 64                       # hidden sizes fixed by MLPModel
_MAX_TILE_B = 8192                       # row cap per grid step
_VMEM_TILE_BUDGET = 16 * 1024 * 1024     # per-step working-set budget


def _mlp_kernel(x_ref, w1_ref, b1_ref, w2_ref, b2_ref, w3_ref, b3_ref, o_ref):
    mxu_dtype = w1_ref.dtype  # bf16 on the fast path; f32 on the exact path

    # ---- fc1 (+ folded BN1) + ReLU ; dropout1 = identity (eval) ----
    h = jnp.dot(x_ref[...], w1_ref[...], preferred_element_type=jnp.float32)
    # bias-add / ReLU in f32 (v5e VPU has no bf16); keep the live intermediate
    # in the matmul dtype so large tiles spill half as many bytes to VMEM.
    h = jnp.maximum(h + b1_ref[...], 0.0).astype(mxu_dtype)

    # ---- fc2 (+ folded BN2) + ReLU ; dropout2 = identity (eval) ----
    h = jnp.dot(h, w2_ref[...], preferred_element_type=jnp.float32)
    h = jnp.maximum(h + b2_ref[...], 0.0).astype(mxu_dtype)

    # ---- fc3 (out_features == 1) + sigmoid ----
    # N=1 matmul would waste 127/255 MXU columns; broadcast-multiply by the
    # (1, H2) weight row on the VPU and reduce across lanes on the XLU (both
    # have slack -- the kernel is HBM / grid-step-overhead bound).
    logits = jnp.sum(h.astype(jnp.float32) * w3_ref[...],
                     axis=-1, keepdims=True) + b3_ref[...]
    o_ref[...] = jax.nn.sigmoid(logits)


def _cores_per_chip():
    """2 TensorCores/chip on v7x-class parts; 1 elsewhere (perf hint only)."""
    try:
        kind = jax.devices()[0].device_kind.lower()
    except Exception:
        return 1
    return 2 if ("v7" in kind or "7x" in kind) else 1


def _choose_tile_b(B, D, x_itemsize, num_cores):
    """Batch tile: as big as the VMEM budget allows (amortize the ~0.35us
    per-grid-step overhead), but keep >= num_cores blocks so a v7x chip can
    shard the batch axis across both TensorCores."""
    if B <= 8:
        return B  # single block covering the full (tiny) batch
    # per-row working set: double-buffered x tile + f32&bf16 h1/h2 copies + out
    per_row = 2 * D * x_itemsize + 6 * (_H1 + _H2) + 16
    cap = min(_MAX_TILE_B, _VMEM_TILE_BUDGET // per_row)
    if num_cores > 1:
        cap = min(cap, pl.cdiv(B, num_cores))
    tile = min(B, cap)
    return max(8, (tile // 8) * 8)  # sublane multiple of 8


def _vmem_limit_bytes(tile_b, D, x_itemsize):
    """Right-sized scoped-VMEM limit: actual need with 2x headroom, capped
    well below v7x's 64 MiB physical VMEM."""
    need = (2 * tile_b * D * x_itemsize                 # double-buffered x tile
            + tile_b * 6 * (_H1 + _H2)                  # h1/h2 f32+bf16 copies
            + 2 * tile_b * 4                            # double-buffered output
            + 4 * (D * _H1 + _H1 * _H2 + 2 * (_H1 + _H2) + 2))  # weights/biases
    return int(min(32 * 1024 * 1024, max(4 * 1024 * 1024, 2 * need)))


@functools.partial(jax.jit, static_argnames=("tile_b", "matmul_dtype"))
def mlp_forward(x, params, tile_b=None, matmul_dtype=jnp.bfloat16):
    (w1, b1, s1, t1, w2, b2, s2, t2, w3, b3) = params
    B, D = x.shape
    H1 = w1.shape[1]
    H2 = w2.shape[1]

    num_cores = _cores_per_chip()
    x_itemsize = jnp.dtype(matmul_dtype).itemsize
    if tile_b is None:
        tile_b = _choose_tile_b(B, D, x_itemsize, num_cores)
    assert tile_b == B or tile_b % 8 == 0, tile_b

    # Stream x in the matmul dtype: halves the dominant HBM stream on the
    # bf16 fast path (upstream producers emitting bf16 skip the convert).
    x_in = x.astype(matmul_dtype)

    # Fold eval-mode BatchNorm (y = h*scale + shift) into the fc weights/bias.
    w1f = (w1 * s1).astype(matmul_dtype)             # (D, H1)
    b1f = b1 * s1 + t1                               # (1, H1), f32
    w2f = (w2 * s2).astype(matmul_dtype)             # (H1, H2)
    b2f = b2 * s2 + t2                               # (1, H2), f32
    w3_row = w3.reshape(1, H2).astype(jnp.float32)   # (1, H2) for VPU path
    b3f = b3.astype(jnp.float32)                     # (1, 1)

    grid_len = pl.cdiv(B, tile_b)
    grid = (grid_len,)

    # Only v7x-class chips (2 TCs) need CORE_PARALLEL to actually split the
    # grid across cores; plain "parallel" everywhere else (proven path).
    use_core_parallel = num_cores > 1 and grid_len >= num_cores
    dim_sem = (pltpu.CORE_PARALLEL,) if use_core_parallel else ("parallel",)

    def full(shape):
        # Parameter blocks: whole array, constant index_map -> not re-DMA'd
        # across grid steps.
        return pl.BlockSpec(shape, lambda i, _n=len(shape): (0,) * _n)

    return pl.pallas_call(
        _mlp_kernel,
        out_shape=jax.ShapeDtypeStruct((B, 1), jnp.float32),
        grid_spec=pltpu.PrefetchScalarGridSpec(
            num_scalar_prefetch=0,
            grid=grid,
            in_specs=[
                pl.BlockSpec((tile_b, D), lambda i: (i, 0)),   # x tile
                full((D, H1)), full((1, H1)),                  # fc1 (BN folded)
                full((H1, H2)), full((1, H2)),                 # fc2 (BN folded)
                full((1, H2)), full((1, 1)),                   # fc3 row + bias
            ],
            out_specs=pl.BlockSpec((tile_b, 1), lambda i: (i, 0)),
        ),
        compiler_params=pltpu.CompilerParams(
            dimension_semantics=dim_sem,
            vmem_limit_bytes=_vmem_limit_bytes(tile_b, D, x_itemsize),
        ),
    )(x_in, w1f, b1f, w2f, b2f, w3_row, b3f)


def make_params(key, input_size, h1=_H1, h2=_H2, eps=1e-5):
    """Deterministic synthetic parameters matching MLPModel(input_size)."""
    ks = jax.random.split(key, 10)

    def linear(kw, kb, fan_in, fan_out):
        bound = 1.0 / jnp.sqrt(fan_in)
        w = jax.random.uniform(kw, (fan_in, fan_out), jnp.float32, -bound, bound)
        b = jax.random.uniform(kb, (1, fan_out), jnp.float32, -bound, bound)
        return w, b

    w1, b1 = linear(ks[0], ks[1], input_size, h1)
    w2, b2 = linear(ks[2], ks[3], h1, h2)
    w3, b3 = linear(ks[4], ks[5], h2, 1)

    def bn(kg, kb, n):
        # non-trivial (but deterministic) BN params + running stats, eval mode
        gamma = 1.0 + 0.1 * jax.random.normal(kg, (1, n), jnp.float32)
        beta = 0.1 * jax.random.normal(kb, (1, n), jnp.float32)
        running_mean = jnp.zeros((1, n), jnp.float32)
        running_var = jnp.ones((1, n), jnp.float32)
        scale = gamma / jnp.sqrt(running_var + eps)
        shift = beta - running_mean * scale
        return scale, shift

    s1, t1 = bn(ks[6], ks[7], h1)
    s2, t2 = bn(ks[8], ks[9], h2)

    return (w1, b1, s1, t1, w2, b2, s2, t2, w3, b3)


def mlp_reference(x, params):
    (w1, b1, s1, t1, w2, b2, s2, t2, w3, b3) = params
    h = jnp.maximum((x @ w1 + b1) * s1 + t1, 0.0)
    h = jnp.maximum((h @ w2 + b2) * s2 + t2, 0.0)
    return jax.nn.sigmoid(h @ w3 + b3)


if __name__ == "__main__":
    key = jax.random.PRNGKey(0)
    k_x, k_p = jax.random.split(key)

    batch = 8
    input_size = 32          # X_train.shape[1] stand-in
    x = jax.random.normal(k_x, (batch, input_size), jnp.float32)
    params = make_params(k_p, input_size)

    ref = mlp_reference(x, params)

    # Exact-precision path (f32 MXU operands): tight tolerance.
    out_f32 = jax.block_until_ready(
        mlp_forward(x, params, matmul_dtype=jnp.float32))
    assert out_f32.shape == (batch, 1), out_f32.shape
    assert jnp.allclose(out_f32, ref, atol=1e-5, rtol=1e-5), (
        float(jnp.max(jnp.abs(out_f32 - ref))))

    # Default fast path (bf16 x / weights / intermediates, f32 accumulation).
    out_fast = jax.block_until_ready(mlp_forward(x, params))
    assert out_fast.shape == (batch, 1), out_fast.shape
    assert jnp.allclose(out_fast, ref, atol=2e-2), (
        float(jnp.max(jnp.abs(out_fast - ref))))

    print("KERNEL_OK")
</pallas_src>

<mosaic_0001>
module attributes {stable_mosaic.version = 11 : i64} {
  func.func @_mlp_kernel(%arg0: i32, %arg1: memref<8x32xf32, #tpu.memory_space<vmem>>, %arg2: memref<32x128xf32, #tpu.memory_space<vmem>>, %arg3: memref<1x128xf32, #tpu.memory_space<vmem>>, %arg4: memref<128x64xf32, #tpu.memory_space<vmem>>, %arg5: memref<1x64xf32, #tpu.memory_space<vmem>>, %arg6: memref<1x64xf32, #tpu.memory_space<vmem>>, %arg7: memref<1x1xf32, #tpu.memory_space<vmem>>, %arg8: memref<8x1xf32, #tpu.memory_space<vmem>>) attributes {dimension_semantics = [#tpu.dimension_semantics<parallel>], iteration_bounds = array<i64: 1>, scalar_prefetch = 0 : i64, scratch_operands = 0 : i64, tpu.core_type = #tpu.core_type<tc>, window_params = [{transform_indices = @transform_0, window_bounds = array<i64: 8, 32>}, {pipeline_mode = #tpu.pipeline_mode<synchronous>, transform_indices = @transform_1, window_bounds = array<i64: 32, 128>}, {pipeline_mode = #tpu.pipeline_mode<synchronous>, transform_indices = @transform_2, window_bounds = array<i64: 1, 128>}, {pipeline_mode = #tpu.pipeline_mode<synchronous>, transform_indices = @transform_3, window_bounds = array<i64: 128, 64>}, {pipeline_mode = #tpu.pipeline_mode<synchronous>, transform_indices = @transform_4, window_bounds = array<i64: 1, 64>}, {pipeline_mode = #tpu.pipeline_mode<synchronous>, transform_indices = @transform_5, window_bounds = array<i64: 1, 64>}, {pipeline_mode = #tpu.pipeline_mode<synchronous>, transform_indices = @transform_6, window_bounds = array<i64: 1, 1>}, {transform_indices = @transform_7, window_bounds = array<i64: 8, 1>}]} {
    %c0 = arith.constant 0 : index
    %c0_0 = arith.constant 0 : index
    %0 = vector.load %arg1[%c0, %c0_0] : memref<8x32xf32, #tpu.memory_space<vmem>>, vector<8x32xf32>
    %c0_1 = arith.constant 0 : index
    %c0_2 = arith.constant 0 : index
    %1 = vector.load %arg2[%c0_1, %c0_2] : memref<32x128xf32, #tpu.memory_space<vmem>>, vector<32x128xf32>
    %cst = arith.constant dense<0.000000e+00> : vector<8x128xf32>
    %2 = tpu.matmul %0, %1, %cst {dimension_numbers = #tpu.dot_dimension_numbers<[1], [0], [0], [1], [0, 0, 1, 1], [], []>} : vector<8x32xf32>, vector<32x128xf32>, vector<8x128xf32> -> vector<8x128xf32>
    %c0_3 = arith.constant 0 : index
    %c0_4 = arith.constant 0 : index
    %3 = vector.load %arg3[%c0_3, %c0_4] : memref<1x128xf32, #tpu.memory_space<vmem>>, vector<1x128xf32>
    %4 = vector.broadcast %3 : vector<1x128xf32> to vector<8x128xf32>
    %5 = arith.addf %2, %4 : vector<8x128xf32>
    %cst_5 = arith.constant 0.000000e+00 : f32
    %6 = vector.broadcast %cst_5 : f32 to vector<8x128xf32>
    %7 = arith.maximumf %5, %6 : vector<8x128xf32>
    %c0_6 = arith.constant 0 : index
    %c0_7 = arith.constant 0 : index
    %8 = vector.load %arg4[%c0_6, %c0_7] : memref<128x64xf32, #tpu.memory_space<vmem>>, vector<128x64xf32>
    %cst_8 = arith.constant dense<0.000000e+00> : vector<8x64xf32>
    %9 = tpu.matmul %7, %8, %cst_8 {dimension_numbers = #tpu.dot_dimension_numbers<[1], [0], [0], [1], [0, 0, 1, 1], [], []>} : vector<8x128xf32>, vector<128x64xf32>, vector<8x64xf32> -> vector<8x64xf32>
    %c0_9 = arith.constant 0 : index
    %c0_10 = arith.constant 0 : index
    %10 = vector.load %arg5[%c0_9, %c0_10] : memref<1x64xf32, #tpu.memory_space<vmem>>, vector<1x64xf32>
    %11 = vector.broadcast %10 : vector<1x64xf32> to vector<8x64xf32>
    %12 = arith.addf %9, %11 : vector<8x64xf32>
    %cst_11 = arith.constant 0.000000e+00 : f32
    %13 = vector.broadcast %cst_11 : f32 to vector<8x64xf32>
    %14 = arith.maximumf %12, %13 : vector<8x64xf32>
    %c0_12 = arith.constant 0 : index
    %c0_13 = arith.constant 0 : index
    %15 = vector.load %arg6[%c0_12, %c0_13] : memref<1x64xf32, #tpu.memory_space<vmem>>, vector<1x64xf32>
    %16 = vector.broadcast %15 : vector<1x64xf32> to vector<8x64xf32>
    %17 = arith.mulf %14, %16 : vector<8x64xf32>
    %cst_14 = arith.constant dense<0.000000e+00> : vector<8xf32>
    %18 = vector.multi_reduction <add>, %17, %cst_14 [1] : vector<8x64xf32> to vector<8xf32>
    %19 = vector.shape_cast %18 : vector<8xf32> to vector<8x1xf32>
    %c0_15 = arith.constant 0 : index
    %c0_16 = arith.constant 0 : index
    %20 = vector.load %arg7[%c0_15, %c0_16] : memref<1x1xf32, #tpu.memory_space<vmem>>, vector<1x1xf32>
    %21 = vector.broadcast %20 : vector<1x1xf32> to vector<8x1xf32>
    %22 = arith.addf %19, %21 : vector<8x1xf32>
    %23 = arith.negf %22 : vector<8x1xf32>
    %24 = math.exp %23 : vector<8x1xf32>
    %cst_17 = arith.constant 1.000000e+00 : f32
    %25 = vector.broadcast %cst_17 : f32 to vector<8x1xf32>
    %26 = arith.addf %25, %24 : vector<8x1xf32>
    %27 = arith.divf %25, %26 : vector<8x1xf32>
    %c0_18 = arith.constant 0 : index
    %c0_19 = arith.constant 0 : index
    %28 = vector.load %arg8[%c0_18, %c0_19] : memref<8x1xf32, #tpu.memory_space<vmem>>, vector<8x1xf32>
    tpu.vector_store %arg8[%c0_18, %c0_19], %27 {strides = array<i32>} : memref<8x1xf32, #tpu.memory_space<vmem>>, vector<8x1xf32>,
    return
  }
  func.func @transform_0(%arg0: i32) -> (i32, i32) {
    %c0_i32 = arith.constant 0 : i32
    %c0_i32_0 = arith.constant 0 : i32
    return %arg0, %c0_i32 : i32, i32
  }
  func.func @transform_1(%arg0: i32) -> (i32, i32) {
    %c0_i32 = arith.constant 0 : i32
    %c0_i32_0 = arith.constant 0 : i32
    %c0_i32_1 = arith.constant 0 : i32
    return %c0_i32, %c0_i32_0 : i32, i32
  }
  func.func @transform_2(%arg0: i32) -> (i32, i32) {
    %c0_i32 = arith.constant 0 : i32
    %c0_i32_0 = arith.constant 0 : i32
    %c0_i32_1 = arith.constant 0 : i32
    return %c0_i32, %c0_i32_0 : i32, i32
  }
  func.func @transform_3(%arg0: i32) -> (i32, i32) {
    %c0_i32 = arith.constant 0 : i32
    %c0_i32_0 = arith.constant 0 : i32
    %c0_i32_1 = arith.constant 0 : i32
    return %c0_i32, %c0_i32_0 : i32, i32
  }
  func.func @transform_4(%arg0: i32) -> (i32, i32) {
    %c0_i32 = arith.constant 0 : i32
    %c0_i32_0 = arith.constant 0 : i32
    %c0_i32_1 = arith.constant 0 : i32
    return %c0_i32, %c0_i32_0 : i32, i32
  }
  func.func @transform_5(%arg0: i32) -> (i32, i32) {
    %c0_i32 = arith.constant 0 : i32
    %c0_i32_0 = arith.constant 0 : i32
    %c0_i32_1 = arith.constant 0 : i32
    return %c0_i32, %c0_i32_0 : i32, i32
  }
  func.func @transform_6(%arg0: i32) -> (i32, i32) {
    %c0_i32 = arith.constant 0 : i32
    %c0_i32_0 = arith.constant 0 : i32
    %c0_i32_1 = arith.constant 0 : i32
    return %c0_i32, %c0_i32_0 : i32, i32
  }
  func.func @transform_7(%arg0: i32) -> (i32, i32) {
    %c0_i32 = arith.constant 0 : i32
    %c0_i32_0 = arith.constant 0 : i32
    return %arg0, %c0_i32 : i32, i32
  }
}

</mosaic_0001>

<bundles_post_ra>
// kernel: mlp_forward.1
= control target key start
LH: loop header
LB: loop body
LE: loop exit
PB: predicated region body
PF: predicated region fallthrough
CT: control target
= control target key end

     0   :  { %vm37_vm0 = vcmask 261120   ;;  %vm108_vm1 = vcmask 523264   ;;  %vm136_vm5 = vcmask 7168   ;;  %s270_s1 = inlined_call_operand.vmem [shape: f32[32,128], index: 1, kind: input, shape index: {}]   ;;  %s271_s3 = inlined_call_operand.vmem [shape: f32[128,64], index: 3, kind: input, shape index: {}]   ;;  %s272_s0 = inlined_call_operand.vmem [shape: f32[8,32], index: 0, kind: input, shape index: {}]   ;;  %s273_s2 = inlined_call_operand.vmem [shape: f32[1,128], index: 2, kind: input, shape index: {}]   ;;  %s274_s4 = inlined_call_operand.vmem [shape: f32[1,64], index: 4, kind: input, shape index: {}]   ;;  %s275_s5 = inlined_call_operand.vmem [shape: f32[1,64], index: 5, kind: input, shape index: {}]   ;;  %s276_s6 = inlined_call_operand.<no memory space> [shape: f32[1,1], index: 6, kind: input, shape index: {}]   ;;  %s277_s7 = inlined_call_operand.vmem [shape: f32[8,1], index: 7, kind: output, shape index: {}]  }
   0x1   :  { %v32_v0 = vld [vmem:[%s270_s1 + $0x18] sm:$0xff]  ;;  %v31_v1 = vld [vmem:[%s270_s1 + $0x10] sm:$0xff]  ;;  %v30_v3 = vld [vmem:[%s270_s1 + $0x8] sm:$0xff]  ;;  %v12_v25 = vstv %s276_s6 }
   0x2   :  { %53 = vmatpush.msra.mxu0 %v32_v0  ;;  %v77_v2 = vld [vmem:[%s271_s3 + $0x78] sm:$0xff]  ;;  %v76_v4 = vld [vmem:[%s271_s3 + $0x70] sm:$0xff]  ;;  %v75_v5 = vld [vmem:[%s271_s3 + $0x68] sm:$0xff]  ;;  %13 = vst [vmem:[#allocation2] sm:$0x1] %v12_v25 }
   0x3   :  { %82 = vmatpush.msra.mxu1 %v77_v2  ;;  %v29_v6 = vld [vmem:[%s270_s1] sm:$0xff]  ;;  %v73_v9 = vld [vmem:[%s271_s3 + $0x58] sm:$0xff]  ;;  %v72_v10 = vld [vmem:[%s271_s3 + $0x50] sm:$0xff] }
   0x4   :  { %54 = vmatpush.msra.mxu0 %v31_v1  ;;  %v28_v7 = vld [vmem:[%s272_s0] sm:$0xff]  ;;  %v71_v11 = vld [vmem:[%s271_s3 + $0x48] sm:$0xff]  ;;  %v69_v13 = vld [vmem:[%s271_s3 + $0x38] sm:$0xff] }
   0x5   :  { %83 = vmatpush.msra.mxu1 %v76_v4  ;;  %v74_v8 = vld [vmem:[%s271_s3 + $0x60] sm:$0xff]  ;;  %v68_v14 = vld [vmem:[%s271_s3 + $0x30] sm:$0xff]  ;;  %v67_v15 = vld [vmem:[%s271_s3 + $0x28] sm:$0xff] }
   0x6   :  { %55 = vmatpush.msra.mxu0 %v30_v3  ;;  %v70_v12 = vld [vmem:[%s271_s3 + $0x40] sm:$0xff]  ;;  %v65_v17 = vld [vmem:[%s271_s3 + $0x18] sm:$0xff]  ;;  %v64_v18 = vld [vmem:[%s271_s3 + $0x10] sm:$0xff] }
   0x7   :  { %84 = vmatpush.msra.mxu1 %v75_v5  ;;  %v66_v16 = vld [vmem:[%s271_s3 + $0x20] sm:$0xff]  ;;  %v63_v19 = vld [vmem:[%s271_s3 + $0x8] sm:$0xff] }
   0x8   :  { %56 = vmatpush.msra.mxu0 %v29_v6  ;;  %v62_v20 = vld [vmem:[%s271_s3] sm:$0xff] }
   0x9   :  { %142 = vmatmul.msk.f32.vlgmr.msra.gmra.mxu0 %vm37_vm0, %v28_v7  ;;  %85 = vmatpush.msra.mxu1 %v74_v8  ;;  %v144_v21 = vld [vmem:[%s273_s2] ss:$0 sm:$0xff] }
   0xa   :  { %v145_v26 = vld [vmem:[%s274_s4] ss:$0 sm:$0xff] }
   0xb   :  { %86 = vmatpush.msra.mxu1 %v73_v9  ;;  %v146_v29 = vld [vmem:[%s275_s5] ss:$0 sm:$0xff] }
   0xc   :  { %v147_v33 = vld [vmem:[#allocation2] ss:$0 sm:$0xff] }
   0xd   :  { %87 = vmatpush.msra.mxu1 %v72_v10 }
   0xf   :  { %88 = vmatpush.msra.mxu1 %v71_v11 }
  0x11   :  { %89 = vmatpush.msra.mxu1 %v70_v12 }
  0x13   :  { %90 = vmatpush.msra.mxu1 %v69_v13 }
  0x15   :  { %91 = vmatpush.msra.mxu1 %v68_v14 }
  0x17   :  { %92 = vmatpush.msra.mxu1 %v67_v15 }
  0x19   :  { %93 = vmatpush.msra.mxu1 %v66_v16 }
  0x1b   :  { %94 = vmatpush.msra.mxu1 %v65_v17 }
  0x1d   :  { %95 = vmatpush.msra.mxu1 %v64_v18 }
  0x1f   :  { %96 = vmatpush.msra.mxu1 %v63_v19 }
  0x21   :  { %97 = vmatpush.msra.mxu1 %v62_v20 }
  0x86   :  { %v58_v22 = vpop.f32.mrf.mxu0 }
  0x87   :  { %v59_v23 = vadd.f32 %v144_v21, %v58_v22 }
  0x89   :  { %v61_v24 = vmax.f32 %v59_v23, 0.0 }
  0x8b   :  { %98 = vmatmul.f32.vlgmr.msra.gmra.mxu1 %v61_v24 }
 0x108   :  { %v99_v27 = vpop.f32.mrf.mxu1 }
 0x109   :  { %v100_v28 = vadd.f32 %v145_v26, %v99_v27 }
 0x10b   :  { %v102_v30 = vmax.f32 %v100_v28, 0.0 }
 0x10d   :  { %v107_v31 = vmul.f32 %v146_v29, %v102_v30 }
 0x10f   :  { %v109_v32 = vsel %vm108_vm1, %v107_v31, 0.0 }
 0x110   :  { %110 = vadd.xlane.f32.xlu0 %v109_v32 }
 0x183   :  { %v111_v34 = vpop.xlane.xlu0 %110 }
 0x184   :  { %v116_v35 = vadd.f32 %v147_v33, %v111_v34 }
 0x186   :  { %v143_v36 = vmul.f32 -1.442695, %v116_v35 }
 0x188   :  { %148 = vpow2.f32 %v143_v36 }
 0x18e   :  { %v149_v37 = vpop.eup %148 }
 0x18f   :  { %v120_v38 = vadd.f32 1.0, %v149_v37 }
 0x191   :  { %150 = vrcp.f32 %v120_v38  ;;  %v132_v42 = vand.u32 2147483648, %v120_v38  ;;  %v130_v44 = vand.u32 2147483647, %v120_v38  ;;  %vm126_vm3 = vweird.f32 %v120_v38 }
 0x193   :  { %v133_v46 = vor.u32 1.1754944e-38, %v132_v42  ;;  %vm131_vm6 = vcmp.eq.f32.partialorder %v130_v44, 8.507059e+37 }
 0x197   :  { %v151_v39 = vpop.eup %150 }
 0x198   :  { %v122_v40 = vmul.f32 %v151_v39, %v120_v38  ;;  %vm127_vm2 = vweird.f32 %v151_v39 }
 0x199   :  { %vm128_vm4 = vmor %vm126_vm3, %vm127_vm2 }
 0x19a   :  { %v123_v41 = vsub.f32 1.0, %v122_v40 }
 0x19c   :  { %v124_v43 = vmul.f32 %v151_v39, %v123_v41 }
 0x19e   :  { %v125_v45 = vadd.f32 %v151_v39, %v124_v43 }
 0x1a0   :  { %v129_v47 = vsel %vm128_vm4, %v151_v39, %v125_v45 }
 0x1a1   :  { %v134_v48 = vsel %vm131_vm6, %v133_v46, %v129_v47 }
 0x1a2   :  { %137 = vst.msk [vmem:[%s277_s7] sm:$0xff] %vm136_vm5, %v134_v48 }

</bundles_post_ra>
